<compile_context>
chip_gen: v7x
topology: tpu7x:2x2x1
jax: 0.10.0
libtpu: 0.0.40
codegen_flags: <defaults>
</compile_context>

<pallas_src>
import jax
import jax.numpy as jnp
import numpy as np
from jax import lax
from jax.experimental import pallas as pl
from jax.experimental.pallas import tpu as pltpu

ATTENTION_LAMDA = 6.0   # opt.attention_lamda (deterministic constant, no checkpoint)
EPS = 1e-8


def _round_up(x, m):
    return ((x + m - 1) // m) * m


def _cdiv(a, b):
    return -(-a // b)


def _encoder_kernel(len_ref, regions_ref, out_ref):
    """One grid step processes a (TB, N, D) slab of the batch.

    len_ref     : VMEM (TB, 1)  int32     -- valid-region counts
    regions_ref : VMEM (TB, N, D) f32/bf16 -- region features
    out_ref     : VMEM (TB, D)  f32       -- pooled, l2-normalized image features
    """
    x = regions_ref[...].astype(jnp.float32)                  # (TB, N, D)
    tb, n, _ = x.shape

    # 1) base grid feature = unmasked mean over regions (torch: mean(dim=1, keepdim=True))
    base = jnp.mean(x, axis=1)                                # (TB, D)

    # 2) attn[b, r] = <base[b], x[b, r]>  -- VPU multiply + lane reduce (no MXU)
    attn = jnp.sum(x * base[:, None, :], axis=2)              # (TB, N)

    # 3) softmax followed by l2norm == exp(shifted logits) followed by l2norm:
    #    the positive per-row softmax denominator cancels, so it is never computed.
    logits = attn * ATTENTION_LAMDA
    e = jnp.exp(logits - jnp.max(logits, axis=1, keepdims=True))        # (TB, N)
    s = e / (jnp.sqrt(jnp.sum(e * e, axis=1, keepdims=True)) + EPS)     # (TB, N)

    # 4) fused residual + masked pooling (GPO stand-in = masked mean):
    #       Σ_r mask·(x + s·base) = Σ_r mask·x + (Σ_r mask·s)·base
    #    The 1/len mean scale cancels under the final l2 normalization.  The
    #    (TB, N, D) residual tensor is never materialized; the mask stays (TB, N).
    idx = lax.broadcasted_iota(jnp.int32, (tb, n), 1)                   # (TB, N)
    maskf = (idx < len_ref[...]).astype(jnp.float32)                    # (TB, N)
    sum_x = jnp.sum(x * maskf[:, :, None], axis=1)                      # (TB, D)
    sum_s = jnp.sum(s * maskf, axis=1, keepdims=True)                   # (TB, 1)
    pooled = sum_x + sum_s * base                                       # (TB, D)

    # 5) final l2 normalization (no_imgnorm=False); exact sqrt/divide, cost is
    #    only O(TB*D), negligible next to the (TB, N, D) passes above.
    norm = jnp.sqrt(jnp.sum(pooled * pooled, axis=1, keepdims=True)) + EPS
    out_ref[...] = pooled / norm


def _vmem_capacity_bytes():
    """Per-core VMEM capacity; conservative v7x value if the query is unavailable."""
    try:
        cap = getattr(pltpu.get_tpu_info(), "vmem_capacity_bytes", None)
        if cap:
            return int(cap)
    except Exception:
        pass
    return 64 << 20


def _choose_block_b(batch, n_regions, d, in_itemsize, data_budget_bytes):
    """Largest multiple-of-8 batch tile whose per-step VMEM footprint fits the budget.

    Per batch row we account for: the double-buffered input tile, an f32 working
    copy of x plus one fused-reduce temporary, the double-buffered output tile,
    and a handful of (N,)-sized attention/mask rows.
    """
    per_row = (2 * n_regions * d * in_itemsize      # input double-buffer
               + 2 * n_regions * d * 4              # f32 copy + one reduce temporary
               + 2 * d * 4                          # output double-buffer
               + 6 * n_regions * 4)                 # attn / softmax / mask rows
    rows = (data_budget_bytes // per_row) // 8 * 8
    return int(max(8, min(rows, _round_up(batch, 8))))


def encoder_image_grid_region(images_regions, image_lengths, *, block_b=None):
    """images_regions: (B, N, D) f32/bf16, image_lengths: (B,) int -> (B, D) f32."""
    B, N, D = images_regions.shape
    itemsize = jnp.dtype(images_regions.dtype).itemsize

    vmem_cap = _vmem_capacity_bytes()
    two_core = vmem_cap <= (64 << 20)                 # v7x-like: 64 MiB/TC, 2 TCs share the grid
    vmem_limit = int(min(0.45 * vmem_cap, float(64 << 20)))

    if block_b is None:
        block_b = _choose_block_b(B, N, D, itemsize, int(0.75 * vmem_limit))
        if two_core and B > 8:
            # Balance the two TensorCores: at least 2 blocks and an even block count.
            block_b = min(block_b, _round_up(_cdiv(B, 2), 8))
            while block_b > 8 and _cdiv(B, block_b) % 2 == 1:
                block_b -= 8
    block_b = max(8, _round_up(block_b, 8))

    lengths = image_lengths.astype(jnp.int32).reshape(B, 1)

    out = pl.pallas_call(
        _encoder_kernel,
        out_shape=jax.ShapeDtypeStruct((B, D), jnp.float32),
        grid=(_cdiv(B, block_b),),                    # partial tail block; rows are independent
        in_specs=[
            pl.BlockSpec((block_b, 1), lambda i: (i, 0)),         # lengths (int32)
            pl.BlockSpec((block_b, N, D), lambda i: (i, 0, 0)),   # region features (native dtype)
        ],
        out_specs=pl.BlockSpec((block_b, D), lambda i: (i, 0)),
        compiler_params=pltpu.CompilerParams(
            dimension_semantics=("parallel",),
            vmem_limit_bytes=vmem_limit,
        ),
    )(lengths, images_regions)
    return out


def _reference(images_regions, image_lengths):
    """Pure-JAX reference mirroring the PyTorch forward (same GPO stand-in)."""
    x = images_regions.astype(jnp.float32)
    base = jnp.mean(x, axis=1, keepdims=True)                       # (B, 1, D)
    attn = jnp.sum(x * base, axis=-1)                               # (B, N)
    s = jax.nn.softmax(attn * ATTENTION_LAMDA, axis=-1)
    s = s / (jnp.sqrt(jnp.sum(s * s, axis=-1, keepdims=True)) + EPS)
    out = x + s[..., None] * base                                   # (B, N, D)
    n = x.shape[1]
    mask = (jnp.arange(n)[None, :] < image_lengths[:, None]).astype(jnp.float32)
    len_f = jnp.maximum(image_lengths, 1).astype(jnp.float32)
    pooled = jnp.sum(out * mask[..., None], axis=1) / len_f[:, None]
    return pooled / (jnp.sqrt(jnp.sum(pooled * pooled, axis=-1, keepdims=True)) + EPS)


if __name__ == "__main__":
    key = jax.random.PRNGKey(0)
    k1, k2, k3 = jax.random.split(key, 3)

    # Case 1: small shape consistent with the module (batch, regions, img_dim).
    B, N, D = 2, 8, 32
    regions = jax.random.normal(k1, (B, N, D), dtype=jnp.float32)
    lengths = jnp.array([8, 5], dtype=jnp.int32)
    out = jax.block_until_ready(encoder_image_grid_region(regions, lengths))
    ref = jax.block_until_ready(_reference(regions, lengths))
    np.testing.assert_allclose(np.asarray(out), np.asarray(ref), rtol=1e-4, atol=1e-5)

    # Case 2: D not a multiple of 128 (full-D block, no HBM pad copy) and a batch
    # that is not a multiple of 8 (partial block), f32 input.
    B2, N2, D2 = 20, 12, 200
    regions2 = 0.1 * jax.random.normal(k2, (B2, N2, D2), dtype=jnp.float32)
    lengths2 = jax.random.randint(jax.random.PRNGKey(1), (B2,), 1, N2 + 1).astype(jnp.int32)
    out2 = jax.block_until_ready(encoder_image_grid_region(regions2, lengths2))
    ref2 = jax.block_until_ready(_reference(regions2, lengths2))
    np.testing.assert_allclose(np.asarray(out2), np.asarray(ref2), rtol=1e-4, atol=1e-5)

    # Case 3: bf16 features stay bf16 in HBM (cast to f32 in-kernel), forced
    # small tile -> multi-step grid with a partial tail block.
    B3, N3, D3 = 17, 12, 128
    regions3 = (0.1 * jax.random.normal(k3, (B3, N3, D3), dtype=jnp.float32)).astype(jnp.bfloat16)
    lengths3 = jax.random.randint(jax.random.PRNGKey(2), (B3,), 1, N3 + 1).astype(jnp.int32)
    out3 = jax.block_until_ready(encoder_image_grid_region(regions3, lengths3, block_b=8))
    ref3 = jax.block_until_ready(_reference(regions3, lengths3))
    np.testing.assert_allclose(np.asarray(out3), np.asarray(ref3), rtol=2e-2, atol=2e-2)

    print("KERNEL_OK")
</pallas_src>

<mosaic_0001>
module attributes {stable_mosaic.version = 11 : i64} {
  func.func @_encoder_kernel(%arg0: i32, %arg1: memref<8x1xi32, #tpu.memory_space<vmem>>, %arg2: memref<8x8x32xf32, #tpu.memory_space<vmem>>, %arg3: memref<8x32xf32, #tpu.memory_space<vmem>>) attributes {dimension_semantics = [#tpu.dimension_semantics<parallel>], iteration_bounds = array<i64: 1>, scalar_prefetch = 0 : i64, scratch_operands = 0 : i64, tpu.core_type = #tpu.core_type<tc>, window_params = [{transform_indices = @transform_0, window_bounds = array<i64: 8, 1>}, {transform_indices = @transform_1, window_bounds = array<i64: 8, 8, 32>}, {transform_indices = @transform_2, window_bounds = array<i64: 8, 32>}]} {
    %c0 = arith.constant 0 : index
    %c0_0 = arith.constant 0 : index
    %c0_1 = arith.constant 0 : index
    %0 = vector.load %arg2[%c0, %c0_0, %c0_1] : memref<8x8x32xf32, #tpu.memory_space<vmem>>, vector<8x8x32xf32>
    %cst = arith.constant dense<0.000000e+00> : vector<8x32xf32>
    %1 = vector.multi_reduction <add>, %0, %cst [1] : vector<8x8x32xf32> to vector<8x32xf32>
    %cst_2 = arith.constant 8.000000e+00 : f32
    %2 = vector.broadcast %cst_2 : f32 to vector<8x32xf32>
    %3 = arith.divf %1, %2 : vector<8x32xf32>
    %4 = vector.shape_cast %3 : vector<8x32xf32> to vector<8x1x32xf32>
    %5 = vector.broadcast %4 : vector<8x1x32xf32> to vector<8x8x32xf32>
    %6 = arith.mulf %0, %5 : vector<8x8x32xf32>
    %cst_3 = arith.constant dense<0.000000e+00> : vector<8x8xf32>
    %7 = vector.multi_reduction <add>, %6, %cst_3 [2] : vector<8x8x32xf32> to vector<8x8xf32>
    %cst_4 = arith.constant 6.000000e+00 : f32
    %8 = vector.broadcast %cst_4 : f32 to vector<8x8xf32>
    %9 = arith.mulf %7, %8 : vector<8x8xf32>
    %cst_5 = arith.constant dense<0xFF800000> : vector<8xf32>
    %10 = vector.multi_reduction <maximumf>, %9, %cst_5 [1] : vector<8x8xf32> to vector<8xf32>
    %11 = vector.shape_cast %10 : vector<8xf32> to vector<8x1xf32>
    %12 = vector.broadcast %11 : vector<8x1xf32> to vector<8x8xf32>
    %13 = arith.subf %9, %12 : vector<8x8xf32>
    %14 = math.exp %13 : vector<8x8xf32>
    %15 = arith.mulf %14, %14 : vector<8x8xf32>
    %cst_6 = arith.constant dense<0.000000e+00> : vector<8xf32>
    %16 = vector.multi_reduction <add>, %15, %cst_6 [1] : vector<8x8xf32> to vector<8xf32>
    %17 = vector.shape_cast %16 : vector<8xf32> to vector<8x1xf32>
    %18 = math.sqrt %17 : vector<8x1xf32>
    %cst_7 = arith.constant 9.99999993E-9 : f32
    %19 = vector.broadcast %cst_7 : f32 to vector<8x1xf32>
    %20 = arith.addf %18, %19 : vector<8x1xf32>
    %21 = vector.broadcast %20 : vector<8x1xf32> to vector<8x8xf32>
    %22 = arith.divf %14, %21 : vector<8x8xf32>
    %23 = tpu.iota {dimensions = array<i32: 1>} : vector<8x8xi32>
    %c0_8 = arith.constant 0 : index
    %c0_9 = arith.constant 0 : index
    %24 = vector.load %arg1[%c0_8, %c0_9] : memref<8x1xi32, #tpu.memory_space<vmem>>, vector<8x1xi32>
    %25 = vector.broadcast %24 : vector<8x1xi32> to vector<8x8xi32>
    %26 = arith.cmpi slt, %23, %25 : vector<8x8xi32>
    %27 = arith.extui %26 : vector<8x8xi1> to vector<8x8xi32>
    %28 = arith.sitofp %27 : vector<8x8xi32> to vector<8x8xf32>
    %29 = vector.shape_cast %28 : vector<8x8xf32> to vector<8x8x1xf32>
    %30 = vector.broadcast %29 : vector<8x8x1xf32> to vector<8x8x32xf32>
    %31 = arith.mulf %0, %30 : vector<8x8x32xf32>
    %cst_10 = arith.constant dense<0.000000e+00> : vector<8x32xf32>
    %32 = vector.multi_reduction <add>, %31, %cst_10 [1] : vector<8x8x32xf32> to vector<8x32xf32>
    %33 = arith.mulf %22, %28 : vector<8x8xf32>
    %cst_11 = arith.constant dense<0.000000e+00> : vector<8xf32>
    %34 = vector.multi_reduction <add>, %33, %cst_11 [1] : vector<8x8xf32> to vector<8xf32>
    %35 = vector.shape_cast %34 : vector<8xf32> to vector<8x1xf32>
    %36 = vector.broadcast %35 : vector<8x1xf32> to vector<8x32xf32>
    %37 = arith.mulf %36, %3 : vector<8x32xf32>
    %38 = arith.addf %32, %37 : vector<8x32xf32>
    %39 = arith.mulf %38, %38 : vector<8x32xf32>
    %cst_12 = arith.constant dense<0.000000e+00> : vector<8xf32>
    %40 = vector.multi_reduction <add>, %39, %cst_12 [1] : vector<8x32xf32> to vector<8xf32>
    %41 = vector.shape_cast %40 : vector<8xf32> to vector<8x1xf32>
    %42 = math.sqrt %41 : vector<8x1xf32>
    %cst_13 = arith.constant 9.99999993E-9 : f32
    %43 = vector.broadcast %cst_13 : f32 to vector<8x1xf32>
    %44 = arith.addf %42, %43 : vector<8x1xf32>
    %45 = vector.broadcast %44 : vector<8x1xf32> to vector<8x32xf32>
    %46 = arith.divf %38, %45 : vector<8x32xf32>
    %c0_14 = arith.constant 0 : index
    %c0_15 = arith.constant 0 : index
    %47 = vector.load %arg3[%c0_14, %c0_15] : memref<8x32xf32, #tpu.memory_space<vmem>>, vector<8x32xf32>
    tpu.vector_store %arg3[%c0_14, %c0_15], %46 {strides = array<i32>} : memref<8x32xf32, #tpu.memory_space<vmem>>, vector<8x32xf32>,
    return
  }
  func.func @transform_0(%arg0: i32) -> (i32, i32) {
    %c0_i32 = arith.constant 0 : i32
    %c0_i32_0 = arith.constant 0 : i32
    return %arg0, %c0_i32 : i32, i32
  }
  func.func @transform_1(%arg0: i32) -> (i32, i32, i32) {
    %c0_i32 = arith.constant 0 : i32
    %c0_i32_0 = arith.constant 0 : i32
    %c0_i32_1 = arith.constant 0 : i32
    return %arg0, %c0_i32, %c0_i32_0 : i32, i32, i32
  }
  func.func @transform_2(%arg0: i32) -> (i32, i32) {
    %c0_i32 = arith.constant 0 : i32
    %c0_i32_0 = arith.constant 0 : i32
    return %arg0, %c0_i32 : i32, i32
  }
}

</mosaic_0001>

<bundles_post_ra>
// kernel: tpu_custom_call.1
= control target key start
LH: loop header
LB: loop body
LE: loop exit
PB: predicated region body
PF: predicated region fallthrough
CT: control target
= control target key end

     0   :  { %7 = vsyncpa [#allocation3], 0  ;;  %s1314_s0 = inlined_call_operand.vmem [shape: s32[2,1], index: 0, kind: input, shape index: {}]   ;;  %s1315_s1 = inlined_call_operand.hbm [shape: f32[2,8,32], index: 1, kind: input, shape index: {}]   ;;  %s1316_s2 = inlined_call_operand.hbm [shape: f32[2,32], index: 2, kind: output, shape index: {}]  }
   0x1   :  { %8 = vsyncpa [#allocation4], 0 }
   0x2   :  { %15 = vsyncadd [#allocation3], 768  ;;  %s956_s9 = smov [#allocation2]   ;;  %s908_s13 = scalar_lea.hbm %s1315_s1, 256 }
   0x3   :  { %s16_s10 = sshll.u32 %s956_s9, 4  ;;  %p909_p0 = scmp.ne.s32.totalorder %s1315_s1, %s908_s13  ;;  %s17_s10 = int_to_ptr.vmem [resolvable:$true] %s16_s10 }
   0x4   :  { %p912_p1 = scmp.lt.u32.totalorder %s908_s13, %s1315_s1 }
   0x6   :  { %p914_p2 = pnand %p912_p1, %p909_p0 }
   0x8   :  { %917 = shalt.err (!%p914_p2)
}
   0x9   :  { %s918_s18 = scalar_lea.vmem %s17_s10, 256  ;;  %s922_s19 = scalar_lea.vmem %s17_s10, 1024 }
   0xa   :  { %p919_p3 = scmp.ne.s32.totalorder %s17_s10, %s918_s18  ;;  %p923_p4 = scmp.lt.s32.totalorder %s17_s10, %s17_s10 }
   0xb   :  { %p924_p5 = scmp.lt.s32.totalorder %s922_s19, %s918_s18 }
   0xd   :  { %p925_p6 = por %p924_p5, %p923_p4 }
   0xf   :  { %p926_p7 = pnand %p925_p6, %p919_p3 }
  0x11   :  { %929 = shalt.err (!%p926_p7)
}
  0x12   :  { %s957_s20 = smov 128   ;;  %s958_s21 = smov 8  }
  0x13   :  { %22 = dma.hbm_to_vmem [thread:$0]  %s1315_s1, 256, %s17_s10, [#allocation3], %s957_s20, %s957_s20, %s958_s21  }
  0x14   :  { %952 = dma.done.wait [#allocation3], 1024  }
  0x15   :  { %953 = vsyncadd [#allocation3], 4294966272  ;;  %vm34_vm0 = vcmask 261120   ;;  %v991_v0 = vld [vmem:[#allocation2] sm:$0xff]  ;;  %v993_v1 = vld [vmem:[#allocation2 + $0x10] sm:$0xff]  ;;  %vm182_vm1 = vcmask 1041409  }
  0x16   :  { %v995_v2 = vld [vmem:[#allocation2 + $0x8] sm:$0xff]  ;;  %v35_v3 = vsel %vm34_vm0, %v991_v0, 0.0  ;;  %v49_v4 = vsel %vm34_vm0, %v993_v1, 0.0  ;;  %v1003_v6 = vld [vmem:[#allocation2 + $0x18] sm:$0xff]  ;;  %v1005_v7 = vld [vmem:[#allocation2 + $0x20] sm:$0xff]  ;;  %vm184_vm2 = vcmask 1042434  }
  0x17   :  { %v42_v5 = vsel %vm34_vm0, %v995_v2, 0.0  ;;  %v1007_v8 = vld [vmem:[#allocation2 + $0x28] sm:$0xff]  ;;  %v36_v9 = vrot.slane %v35_v3, 4  ;;  %v50_v10 = vrot.slane %v49_v4, 4  ;;  %v56_v12 = vsel %vm34_vm0, %v1003_v6, 0.0  ;;  %v1011_v13 = vld [vmem:[#allocation2 + $0x30] sm:$0xff] }
  0x18   :  { %v43_v11 = vrot.slane %v42_v5, 4  ;;  %v1013_v14 = vld [vmem:[#allocation2 + $0x38] sm:$0xff]  ;;  %v57_v15 = vrot.slane %v56_v12, 4  ;;  %v63_v16 = vsel %vm34_vm0, %v1005_v7, 0.0  ;;  %v70_v17 = vsel %vm34_vm0, %v1007_v8, 0.0 }
  0x19   :  { %v77_v18 = vsel %vm34_vm0, %v1011_v13, 0.0  ;;  %v37_v19 = vadd.f32 %v36_v9, %v35_v3  ;;  %v51_v20 = vadd.f32 %v50_v10, %v49_v4  ;;  %v64_v22 = vrot.slane %v63_v16, 4 }
  0x1a   :  { %v44_v21 = vadd.f32 %v43_v11, %v42_v5  ;;  %v58_v23 = vadd.f32 %v57_v15, %v56_v12  ;;  %v71_v24 = vrot.slane %v70_v17, 4  ;;  %v78_v25 = vrot.slane %v77_v18, 4 }
  0x1b   :  { %v84_v26 = vsel %vm34_vm0, %v1013_v14, 0.0  ;;  %v38_v27 = vrot.slane %v37_v19, 2  ;;  %v52_v28 = vrot.slane %v51_v20, 2  ;;  %v65_v30 = vadd.f32 %v64_v22, %v63_v16 }
  0x1c   :  { %v45_v29 = vrot.slane %v44_v21, 2  ;;  %v59_v31 = vrot.slane %v58_v23, 2  ;;  %v72_v32 = vadd.f32 %v71_v24, %v70_v17  ;;  %v79_v33 = vadd.f32 %v78_v25, %v77_v18 }
  0x1d   :  { %v85_v34 = vrot.slane %v84_v26, 4  ;;  %v39_v35 = vadd.f32 %v38_v27, %v37_v19  ;;  %v53_v36 = vadd.f32 %v52_v28, %v51_v20  ;;  %v66_v38 = vrot.slane %v65_v30, 2 }
  0x1e   :  { %v46_v37 = vadd.f32 %v45_v29, %v44_v21  ;;  %v60_v39 = vadd.f32 %v59_v31, %v58_v23  ;;  %vm186_vm3 = vcmask 1043459   ;;  %v73_v40 = vrot.slane %v72_v32, 2 }
  0x1f   :  { %v80_v41 = vrot.slane %v79_v33, 2  ;;  %v86_v42 = vadd.f32 %v85_v34, %v84_v26  ;;  %v40_v43 = vrot.slane %v39_v35, 1  ;;  %v54_v44 = vrot.slane %v53_v36, 1 }
  0x20   :  { %v47_v45 = vrot.slane %v46_v37, 1  ;;  %v67_v46 = vadd.f32 %v66_v38, %v65_v30  ;;  %v61_v47 = vrot.slane %v60_v39, 1  ;;  %v74_v48 = vadd.f32 %v73_v40, %v72_v32 }
  0x21   :  { %v81_v49 = vadd.f32 %v80_v41, %v79_v33  ;;  %v87_v50 = vrot.slane %v86_v42, 2  ;;  %v41_v51 = vadd.f32 %v40_v43, %v39_v35  ;;  %v55_v52 = vadd.f32 %v54_v44, %v53_v36 }
  0x22   :  { %v48_v53 = vadd.f32 %v47_v45, %v46_v37  ;;  %v68_v54 = vrot.slane %v67_v46, 1  ;;  %v62_v55 = vadd.f32 %v61_v47, %v60_v39  ;;  %v75_v56 = vrot.slane %v74_v48, 1 }
  0x23   :  { %v82_v57 = vrot.slane %v81_v49, 1  ;;  %v88_v58 = vadd.f32 %v87_v50, %v86_v42  ;;  %v92_v59 = vmul.f32 0.125, %v41_v51  ;;  %v94_v60 = vmul.f32 0.125, %v55_v52 }
  0x24   :  { %v93_v61 = vmul.f32 0.125, %v48_v53  ;;  %v69_v62 = vadd.f32 %v68_v54, %v67_v46  ;;  %v95_v63 = vmul.f32 0.125, %v62_v55  ;;  %v76_v3 = vadd.f32 %v75_v56, %v74_v48 }
  0x25   :  { %v83_v4 = vadd.f32 %v82_v57, %v81_v49  ;;  %v89_v5 = vrot.slane %v88_v58, 1  ;;  %v100_v9 = vmul.f32 %v92_v59, %v991_v0  ;;  %v102_v10 = vmul.f32 %v94_v60, %v993_v1 }
  0x26   :  { %v101_v11 = vmul.f32 %v93_v61, %v995_v2  ;;  %v697_v12 = vsel %vm182_vm1, %v93_v61, %v92_v59  ;;  %v103_v16 = vmul.f32 %v95_v63, %v1003_v6  ;;  %v1029_v17 = vmul.f32 0.125, %v69_v62 }
  0x27   :  { %v698_v15 = vsel %vm184_vm2, %v94_v60, %v697_v12  ;;  %v1031_v18 = vmul.f32 0.125, %v76_v3  ;;  %v108_v19 = vsel %vm34_vm0, %v100_v9, 0.0  ;;  %v114_v20 = vsel %vm34_vm0, %v102_v10, 0.0 }
  0x28   :  { %v1036_v21 = vsel %vm186_vm3, %v95_v63, %v698_v15  ;;  %109 = vadd.xlane.f32.xlu0 %v108_v19  ;;  %115 = vadd.xlane.f32.xlu1 %v114_v20  ;;  %v111_v22 = vsel %vm34_vm0, %v101_v11, 0.0  ;;  %v117_v23 = vsel %vm34_vm0, %v103_v16, 0.0  ;;  %v104_v24 = vmul.f32 %v1029_v17, %v1005_v7 }
  0x29   :  { %v105_v25 = vmul.f32 %v1031_v18, %v1007_v8  ;;  %v1044_v26 = vmul.f32 0.125, %v83_v4  ;;  %v90_v27 = vadd.f32 %v89_v5, %v88_v58  ;;  %v148_v35 = vlaneseq }
  0x2a   :  { %v120_v29 = vsel %vm34_vm0, %v104_v24, 0.0  ;;  %vm188_vm4 = vcmask 1044484   ;;  %vm190_vm5 = vcmask 1045509   ;;  %vm192_vm6 = vcmask 1046534  }
  0x2b   :  { %v1046_v28 = vmul.f32 0.125, %v90_v27  ;;  %v123_v30 = vsel %vm34_vm0, %v105_v25, 0.0  ;;  %v106_v31 = vmul.f32 %v1044_v26, %v1011_v13  ;;  %v1056_v36 = vand.u32 127, %v148_v35 }
  0x2c   :  { %112 = vadd.xlane.f32.xlu0 %v111_v22  ;;  %118 = vadd.xlane.f32.xlu1 %v117_v23  ;;  %v1058_v37 = vshrl.u32 %v148_v35, 7  ;;  %vm194_vm7 = vcmask 1047559   ;;  %vm197_vm8 = vcmask 64512   ;;  %v959_v15 = vmov 0  }
  0x2d   :  { %v107_v32 = vmul.f32 %v1046_v28, %v1013_v14  ;;  %v126_v33 = vsel %vm34_vm0, %v106_v31, 0.0  ;;  %855 = vset.pattern.permute.xlu0 %v959_v15  ;;  %854 = vset.pattern.permute.xlu1 %v959_v15 }
  0x2e   :  { %v1062_v40 = vsub.s32 %v1056_v36, %v1058_v37  ;;  %v1081_v16 = vsub.s32 1, %v1058_v37  ;;  %v1084_v19 = vsub.s32 0, %v1058_v37  ;;  %v1087_v20 = vsub.s32 2, %v1058_v37 }
  0x2f   :  { %v129_v34 = vsel %vm34_vm0, %v107_v32, 0.0  ;;  %v1090_v22 = vsub.s32 3, %v1058_v37 }
  0x30   :  { %121 = vadd.xlane.f32.xlu0 %v120_v29  ;;  %124 = vadd.xlane.f32.xlu1 %v123_v30  ;;  %v1097_v30 = vsub.s32 4, %v1058_v37 }
  0x34   :  { %127 = vadd.xlane.f32.xlu0 %v126_v33  ;;  %130 = vadd.xlane.f32.xlu1 %v129_v34 }
  0xb5   :  { %v110_v38 = vpop.xlane.xlu0 %109  ;;  %v116_v39 = vpop.xlane.xlu1 %115 }
  0xb6   :  { %v132_v41 = vmul.f32 6.0, %v110_v38  ;;  %v134_v42 = vmul.f32 6.0, %v116_v39 }
  0xb8   :  { %v153_v47 = vrot.slane %v132_v41, %v1062_v40  ;;  %v161_v50 = vrot.slane %v134_v42, %v1062_v40 }
  0xb9   :  { %v113_v43 = vpop.xlane.xlu0 %112  ;;  %v119_v44 = vpop.xlane.xlu1 %118 }
  0xba   :  { %v133_v45 = vmul.f32 6.0, %v113_v43  ;;  %v135_v46 = vmul.f32 6.0, %v119_v44  ;;  %v1101_v44 = vsub.s32 5, %v1058_v37 }
  0xbc   :  { %v157_v48 = vrot.slane %v133_v45, %v1062_v40  ;;  %v165_v49 = vrot.slane %v135_v46, %v1062_v40 }
  0xbd   :  { %v122_v51 = vpop.xlane.xlu0 %121  ;;  %v125_v52 = vpop.xlane.xlu1 %124 }
  0xbe   :  { %v183_v53 = vsel %vm182_vm1, %v157_v48, %v153_v47  ;;  %v136_v54 = vmul.f32 6.0, %v122_v51  ;;  %v137_v55 = vmul.f32 6.0, %v125_v52  ;;  %v1104_v47 = vsub.s32 6, %v1058_v37 }
  0xbf   :  { %v185_v56 = vsel %vm184_vm2, %v161_v50, %v183_v53 }
  0xc0   :  { %v187_v57 = vsel %vm186_vm3, %v165_v49, %v185_v56  ;;  %v169_v58 = vrot.slane %v136_v54, %v1062_v40  ;;  %v173_v59 = vrot.slane %v137_v55, %v1062_v40 }
  0xc1   :  { %v128_v60 = vpop.xlane.xlu0 %127  ;;  %v131_v61 = vpop.xlane.xlu1 %130 }
  0xc2   :  { %v189_v62 = vsel %vm188_vm4, %v169_v58, %v187_v57  ;;  %v138_v63 = vmul.f32 6.0, %v128_v60  ;;  %v139_v3 = vmul.f32 6.0, %v131_v61 }
  0xc3   :  { %v191_v9 = vsel %vm190_vm5, %v173_v59, %v189_v62 }
  0xc4   :  { %v177_v4 = vrot.slane %v138_v63, %v1062_v40  ;;  %v181_v5 = vrot.slane %v139_v3, %v1062_v40 }
  0xc6   :  { %v193_v10 = vsel %vm192_vm6, %v177_v4, %v191_v9 }
  0xc7   :  { %v195_v11 = vsel %vm194_vm7, %v181_v5, %v193_v10 }
  0xc8   :  { %v198_v12 = vsel %vm197_vm8, %v195_v11, -inf }
  0xc9   :  { %199 = vmax.xlane.f32.xlu0 %v198_v12 }
 0x156   :  { %v200_v23 = vpop.xlane.xlu0 %199 }
 0x157   :  { %v209_v24 = vrot.slane %v200_v23, %v1081_v16  ;;  %v205_v25 = vrot.slane %v200_v23, %v1084_v19  ;;  %v213_v27 = vrot.slane %v200_v23, %v1087_v20  ;;  %v217_v29 = vrot.slane %v200_v23, %v1090_v22 }
 0x158   :  { %v221_v43 = vrot.slane %v200_v23, %v1097_v30  ;;  %v229_v50 = vrot.slane %v200_v23, %v1104_v47 }
 0x159   :  { %v243_v31 = vsub.f32 %v133_v45, %v209_v24  ;;  %v242_v32 = vsub.f32 %v132_v41, %v205_v25  ;;  %v244_v33 = vsub.f32 %v134_v42, %v213_v27  ;;  %v245_v39 = vsub.f32 %v135_v46, %v217_v29 }
 0x15a   :  { %v246_v49 = vsub.f32 %v136_v54, %v221_v43  ;;  %v225_v41 = vrot.slane %v200_v23, %v1101_v44  ;;  %v1108_v42 = vsub.s32 7, %v1058_v37  ;;  %v248_v57 = vsub.f32 %v138_v63, %v229_v50 }
 0x15b   :  { %v252_v34 = vmul.f32 1.442695, %v243_v31  ;;  %v250_v35 = vmul.f32 1.442695, %v242_v32  ;;  %v254_v38 = vmul.f32 1.442695, %v244_v33 }
 0x15c   :  { %v256_v48 = vmul.f32 1.442695, %v245_v39  ;;  %v258_v45 = vmul.f32 1.442695, %v246_v49  ;;  %v247_v46 = vsub.f32 %v137_v55, %v225_v41  ;;  %v233_v52 = vrot.slane %v200_v23, %v1108_v42  ;;  %v414_v23 = vld [vmem:[%s1314_s0] sm:$0xff] }
 0x15d   :  { %856 = vpow2.f32 %v252_v34  ;;  %v262_v55 = vmul.f32 1.442695, %v248_v57 }
 0x15e   :  { %858 = vpow2.f32 %v250_v35  ;;  %v260_v54 = vmul.f32 1.442695, %v247_v46  ;;  %v249_v59 = vsub.f32 %v139_v3, %v233_v52 }
 0x15f   :  { %860 = vpow2.f32 %v254_v38 }
 0x160   :  { %862 = vpow2.f32 %v256_v48  ;;  %v264_v62 = vmul.f32 1.442695, %v249_v59 }
 0x161   :  { %864 = vpow2.f32 %v258_v45 }
 0x162   :  { %866 = vpow2.f32 %v260_v54 }
 0x163   :  { %868 = vpow2.f32 %v262_v55 }
 0x164   :  { %870 = vpow2.f32 %v264_v62 }
 0x167   :  { %v1111_v51 = vpop.eup %856 }
 0x168   :  { %v1114_v53 = vpop.eup %858  ;;  %v267_v56 = vmul.f32 %v1111_v51, %v1111_v51 }
 0x169   :  { %v266_v37 = vmul.f32 %v1114_v53, %v1114_v53  ;;  %v1120_v58 = vpop.eup %860 }
 0x16a   :  { %286 = vperm.xlu0 %855, %v267_v56   ;;  %v268_v60 = vmul.f32 %v1120_v58, %v1120_v58  ;;  %v1124_v61 = vpop.eup %862 }
 0x16b   :  { %283 = vperm.xlu1 %854, %v266_v37   ;;  %v269_v63 = vmul.f32 %v1124_v61, %v1124_v61  ;;  %v1128_v4 = vpop.eup %864 }
 0x16c   :  { %v270_v5 = vmul.f32 %v1128_v4, %v1128_v4  ;;  %v1132_v9 = vpop.eup %866 }
 0x16d   :  { %v271_v3 = vmul.f32 %v1132_v9, %v1132_v9  ;;  %v1136_v10 = vpop.eup %868 }
 0x16e   :  { %v272_v11 = vmul.f32 %v1136_v10, %v1136_v10  ;;  %v1140_v12 = vpop.eup %870 }
 0x16f   :  { %289 = vperm.xlu1 %854, %v268_v60   ;;  %v273_v15 = vmul.f32 %v1140_v12, %v1140_v12  ;;  %v960_v60 = vmov 0.0  }
 0x173   :  { %292 = vperm.xlu1 %854, %v269_v63  }
 0x177   :  { %295 = vperm.xlu1 %854, %v270_v5  }
 0x17b   :  { %298 = vperm.xlu1 %854, %v271_v3  }
 0x17f   :  { %301 = vperm.xlu1 %854, %v272_v11  }
 0x183   :  { %304 = vperm.xlu1 %854, %v273_v15  }
 0x187   :  { %416 = vperm.xlu1 %854, %v414_v23  }
 0x1e9   :  { %v287_v31 = vpop.permute.xlu0 %286 }
 0x1ea   :  { %v284_v24 = vpop.permute.xlu1 %283  ;;  %v313_v33 = vrot.slane %v287_v31, %v1062_v40 }
 0x1eb   :  { %v309_v34 = vrot.slane %v284_v24, %v1062_v40 }
 0x1ed   :  { %v338_v48 = vsel %vm182_vm1, %v313_v33, %v309_v34 }
 0x1ee   :  { %v290_v25 = vpop.permute.xlu1 %289 }
 0x1ef   :  { %v317_v35 = vrot.slane %v290_v25, %v1062_v40 }
 0x1f1   :  { %v339_v41 = vsel %vm184_vm2, %v317_v35, %v338_v48 }
 0x1f2   :  { %v293_v27 = vpop.permute.xlu1 %292 }
 0x1f3   :  { %v321_v38 = vrot.slane %v293_v27, %v1062_v40 }
 0x1f5   :  { %v340_v46 = vsel %vm186_vm3, %v321_v38, %v339_v41 }
 0x1f6   :  { %v296_v29 = vpop.permute.xlu1 %295 }
 0x1f7   :  { %v325_v39 = vrot.slane %v296_v29, %v1062_v40 }
 0x1f9   :  { %v341_v50 = vsel %vm188_vm4, %v325_v39, %v340_v46 }
 0x1fa   :  { %v299_v32 = vpop.permute.xlu1 %298 }
 0x1fb   :  { %v329_v49 = vrot.slane %v299_v32, %v1062_v40 }
 0x1fd   :  { %v342_v56 = vsel %vm190_vm5, %v329_v49, %v341_v50 }
 0x1fe   :  { %v302_v43 = vpop.permute.xlu1 %301 }
 0x1ff   :  { %v333_v45 = vrot.slane %v302_v43, %v1062_v40 }
 0x201   :  { %v343_v57 = vsel %vm192_vm6, %v333_v45, %v342_v56 }
 0x202   :  { %v305_v52 = vpop.permute.xlu1 %304 }
 0x203   :  { %v337_v54 = vrot.slane %v305_v52, %v1062_v40 }
 0x205   :  { %v344_v37 = vsel %vm194_vm7, %v337_v54, %v343_v57 }
 0x206   :  { %v417_v55 = vpop.permute.xlu1 %416  ;;  %v346_v59 = vsel %vm197_vm8, %v344_v37, 0.0 }
 0x207   :  { %vm418_vm9 = vcmp.lt.s32.totalorder %v1056_v36, %v417_v55  ;;  %347 = vadd.xlane.f32.xlu1 %v346_v59 }
 0x208   :  { %v845_v62 = vsel %vm418_vm9, 1.0, %v960_v60 }
 0x209   :  { %v1165_v63 = vrot.slane %v845_v62, %v1084_v19  ;;  %v1169_v5 = vrot.slane %v845_v62, %v1081_v16  ;;  %v1173_v3 = vrot.slane %v845_v62, %v1087_v20  ;;  %v1177_v36 = vrot.slane %v845_v62, %v1090_v22 }
 0x20a   :  { %v1181_v11 = vrot.slane %v845_v62, %v1097_v30  ;;  %v1185_v15 = vrot.slane %v845_v62, %v1101_v44  ;;  %v1189_v23 = vrot.slane %v845_v62, %v1104_v47  ;;  %v1193_v24 = vrot.slane %v845_v62, %v1108_v42 }
 0x20b   :  { %547 = vbcast.lane.b32.xlu0 %v1165_v63, 256 }
 0x20f   :  { %554 = vbcast.lane.b32.xlu0 %v1169_v5, 256 }
 0x213   :  { %561 = vbcast.lane.b32.xlu0 %v1173_v3, 256 }
 0x217   :  { %568 = vbcast.lane.b32.xlu0 %v1177_v36, 256 }
 0x21b   :  { %575 = vbcast.lane.b32.xlu0 %v1181_v11, 256 }
 0x21f   :  { %582 = vbcast.lane.b32.xlu0 %v1185_v15, 256 }
 0x223   :  { %589 = vbcast.lane.b32.xlu0 %v1189_v23, 256 }
 0x227   :  { %596 = vbcast.lane.b32.xlu0 %v1193_v24, 256 }
 0x27d   :  { %v548_v27 = vpop.permute.xlu0 %547 }
 0x281   :  { %v555_v29 = vpop.permute.xlu0 %554 }
 0x285   :  { %v562_v34 = vpop.permute.xlu0 %561 }
 0x289   :  { %v569_v41 = vpop.permute.xlu0 %568 }
 0x28d   :  { %v576_v50 = vpop.permute.xlu0 %575 }
 0x291   :  { %v583_v54 = vpop.permute.xlu0 %582 }
 0x294   :  { %v348_v25 = vpop.xlane.xlu1 %347 }
 0x295   :  { %872 = vrsqrt.f32 %v348_v25  ;;  %vm351_vm10 = vcmp.eq.f32.partialorder %v348_v25, inf  ;;  %v354_v33 = vand.u32 2147483648, %v348_v25  ;;  %vm353_vm11 = vcmp.eq.f32.partialorder %v348_v25, 0.0 }
 0x29f   :  { %v873_v31 = vpop.eup %872 }
 0x2a0   :  { %v350_v32 = vmul.f32 %v873_v31, %v348_v25 }
 0x2a2   :  { %v352_v35 = vsel %vm351_vm10, %v348_v25, %v350_v32 }
 0x2a3   :  { %v355_v38 = vsel %vm353_vm11, %v354_v33, %v352_v35 }
 0x2a4   :  { %v356_v39 = vadd.f32 1e-08, %v355_v38 }
 0x2a6   :  { %v385_v43 = vrot.slane %v356_v39, %v1104_v47  ;;  %v365_v48 = vrot.slane %v356_v39, %v1081_v16  ;;  %v361_v49 = vrot.slane %v356_v39, %v1084_v19  ;;  %v369_v45 = vrot.slane %v356_v39, %v1087_v20 }
 0x2a7   :  { %v373_v46 = vrot.slane %v356_v39, %v1090_v22  ;;  %v377_v52 = vrot.slane %v356_v39, %v1097_v30  ;;  %v381_v47 = vrot.slane %v356_v39, %v1101_v44  ;;  %v389_v22 = vrot.slane %v356_v39, %v1108_v42  ;;  %v590_v44 = vpop.permute.xlu0 %589 }
 0x2a8   :  { %874 = vrcp.f32 %v385_v43 }
 0x2a9   :  { %876 = vrcp.f32 %v365_v48 }
 0x2aa   :  { %878 = vrcp.f32 %v361_v49 }
 0x2ab   :  { %880 = vrcp.f32 %v369_v45 }
 0x2ac   :  { %882 = vrcp.f32 %v373_v46 }
 0x2ad   :  { %884 = vrcp.f32 %v377_v52 }
 0x2ae   :  { %886 = vrcp.f32 %v381_v47 }
 0x2af   :  { %888 = vrcp.f32 %v389_v22 }
 0x2b2   :  { %v875_v56 = vpop.eup %874 }
 0x2b3   :  { %v877_v16 = vpop.eup %876  ;;  %v411_v55 = vmul.f32 %v875_v56, %v1136_v10 }
 0x2b4   :  { %v879_v19 = vpop.eup %878  ;;  %v401_v57 = vmul.f32 %v877_v16, %v1111_v51 }
 0x2b5   :  { %v881_v20 = vpop.eup %880  ;;  %v399_v37 = vmul.f32 %v879_v19, %v1114_v53  ;;  %v612_v25 = vmul.f32 %v590_v44, %v411_v55 }
 0x2b6   :  { %v607_v59 = vmul.f32 %v555_v29, %v401_v57  ;;  %v403_v30 = vmul.f32 %v881_v20, %v1120_v58  ;;  %v883_v62 = vpop.eup %882 }
 0x2b7   :  { %v606_v60 = vmul.f32 %v548_v27, %v399_v37  ;;  %v405_v51 = vmul.f32 %v883_v62, %v1124_v61  ;;  %v885_v32 = vpop.eup %884 }
 0x2b8   :  { %626 = vperm.xlu1 %854, %v607_v59   ;;  %v608_v31 = vmul.f32 %v562_v34, %v403_v30  ;;  %v407_v42 = vmul.f32 %v885_v32, %v1128_v4  ;;  %v887_v10 = vpop.eup %886  ;;  %v597_v34 = vpop.permute.xlu0 %596 }
 0x2b9   :  { %623 = vperm.xlu0 %855, %v606_v60   ;;  %v609_v53 = vmul.f32 %v569_v41, %v405_v51  ;;  %v409_v58 = vmul.f32 %v887_v10, %v1132_v9  ;;  %v889_v29 = vpop.eup %888 }
 0x2ba   :  { %v610_v27 = vmul.f32 %v576_v50, %v407_v42  ;;  %v413_v33 = vmul.f32 %v889_v29, %v1140_v12 }
 0x2bb   :  { %v611_v35 = vmul.f32 %v583_v54, %v409_v58 }
 0x2bc   :  { %641 = vperm.xlu1 %854, %v612_v25   ;;  %v613_v38 = vmul.f32 %v597_v34, %v413_v33 }
 0x2bd   :  { %629 = vperm.xlu0 %855, %v608_v31  }
 0x2c1   :  { %632 = vperm.xlu0 %855, %v609_v53  }
 0x2c5   :  { %635 = vperm.xlu0 %855, %v610_v27  }
 0x2c9   :  { %638 = vperm.xlu0 %855, %v611_v35  }
 0x2cd   :  { %644 = vperm.xlu0 %855, %v613_v38  }
 0x2d1   :  { %433 = vbcast.lane.b32.xlu0 %v1169_v5, 256 }
 0x2d5   :  { %440 = vbcast.lane.b32.xlu0 %v1173_v3, 256 }
 0x2d9   :  { %426 = vbcast.lane.b32.xlu0 %v1165_v63, 256 }
 0x2dd   :  { %447 = vbcast.lane.b32.xlu0 %v1177_v36, 256 }
 0x2e1   :  { %454 = vbcast.lane.b32.xlu0 %v1181_v11, 256 }
 0x2e5   :  { %461 = vbcast.lane.b32.xlu0 %v1185_v15, 256 }
 0x2e9   :  { %468 = vbcast.lane.b32.xlu0 %v1189_v23, 256 }
 0x2ed   :  { %475 = vbcast.lane.b32.xlu0 %v1193_v24, 256 }
 0x337   :  { %v627_v9 = vpop.permute.xlu1 %626 }
 0x338   :  { %v624_v61 = vpop.permute.xlu0 %623  ;;  %v653_v5 = vrot.slane %v627_v9, %v1062_v40 }
 0x339   :  { %v649_v3 = vrot.slane %v624_v61, %v1062_v40 }
 0x33b   :  { %v678_v15 = vsel %vm182_vm1, %v653_v5, %v649_v3  ;;  %v642_v43 = vpop.permute.xlu1 %641 }
 0x33c   :  { %v630_v4 = vpop.permute.xlu0 %629  ;;  %v673_v46 = vrot.slane %v642_v43, %v1062_v40 }
 0x33d   :  { %v657_v63 = vrot.slane %v630_v4, %v1062_v40  ;;  %v700_v4 = vsel %vm188_vm4, %v1029_v17, %v1036_v21 }
 0x33f   :  { %v679_v23 = vsel %vm184_vm2, %v657_v63, %v678_v15  ;;  %v701_v15 = vsel %vm190_vm5, %v1031_v18, %v700_v4 }
 0x340   :  { %v633_v12 = vpop.permute.xlu0 %632  ;;  %v702_v17 = vsel %vm192_vm6, %v1044_v26, %v701_v15 }
 0x341   :  { %v661_v36 = vrot.slane %v633_v12, %v1062_v40  ;;  %v703_v18 = vsel %vm194_vm7, %v1046_v28, %v702_v17 }
 0x343   :  { %v680_v48 = vsel %vm186_vm3, %v661_v36, %v679_v23 }
 0x344   :  { %v636_v39 = vpop.permute.xlu0 %635 }
 0x345   :  { %v665_v11 = vrot.slane %v636_v39, %v1062_v40 }
 0x347   :  { %v681_v41 = vsel %vm188_vm4, %v665_v11, %v680_v48 }
 0x348   :  { %v639_v24 = vpop.permute.xlu0 %638 }
 0x349   :  { %v669_v49 = vrot.slane %v639_v24, %v1062_v40 }
 0x34b   :  { %v682_v45 = vsel %vm190_vm5, %v669_v49, %v681_v41 }
 0x34c   :  { %v645_v50 = vpop.permute.xlu0 %644  ;;  %v683_v56 = vsel %vm192_vm6, %v673_v46, %v682_v45 }
 0x34d   :  { %v677_v52 = vrot.slane %v645_v50, %v1062_v40 }
 0x34f   :  { %v684_v47 = vsel %vm194_vm7, %v677_v52, %v683_v56 }
 0x350   :  { %v686_v16 = vsel %vm197_vm8, %v684_v47, 0.0  ;;  %v434_v54 = vpop.permute.xlu0 %433 }
 0x351   :  { %687 = vadd.xlane.f32.xlu1 %v686_v16  ;;  %v478_v60 = vmul.f32 %v434_v54, %v995_v2 }
 0x353   :  { %v492_v32 = vsel %vm34_vm0, %v478_v60, 0.0 }
 0x354   :  { %v441_v19 = vpop.permute.xlu0 %440  ;;  %v493_v42 = vrot.slane %v492_v32, 4 }
 0x355   :  { %v479_v30 = vmul.f32 %v441_v19, %v993_v1 }
 0x356   :  { %v494_v35 = vadd.f32 %v493_v42, %v492_v32 }
 0x357   :  { %v499_v53 = vsel %vm34_vm0, %v479_v30, 0.0 }
 0x358   :  { %v427_v57 = vpop.permute.xlu0 %426  ;;  %v495_v63 = vrot.slane %v494_v35, 2 }
 0x359   :  { %v477_v40 = vmul.f32 %v427_v57, %v991_v0 }
 0x35a   :  { %v496_v49 = vadd.f32 %v495_v63, %v494_v35 }
 0x35b   :  { %v485_v2 = vsel %vm34_vm0, %v477_v40, 0.0 }
 0x35c   :  { %v448_v20 = vpop.permute.xlu0 %447  ;;  %v486_v10 = vrot.slane %v485_v2, 4  ;;  %v497_v47 = vrot.slane %v496_v49, 1 }
 0x35d   :  { %v480_v62 = vmul.f32 %v448_v20, %v1003_v6 }
 0x35e   :  { %v487_v38 = vadd.f32 %v486_v10, %v485_v2 }
 0x35f   :  { %v506_v1 = vsel %vm34_vm0, %v480_v62, 0.0 }
 0x360   :  { %v455_v37 = vpop.permute.xlu0 %454  ;;  %v488_v36 = vrot.slane %v487_v38, 2 }
 0x361   :  { %v481_v44 = vmul.f32 %v455_v37, %v1005_v7 }
 0x362   :  { %v489_v45 = vadd.f32 %v488_v36, %v487_v38 }
 0x363   :  { %v513_v0 = vsel %vm34_vm0, %v481_v44, 0.0 }
 0x364   :  { %v462_v55 = vpop.permute.xlu0 %461  ;;  %v514_v27 = vrot.slane %v513_v0, 4  ;;  %v490_v54 = vrot.slane %v489_v45, 1 }
 0x365   :  { %v482_v25 = vmul.f32 %v462_v55, %v1007_v8 }
 0x366   :  { %v515_v9 = vadd.f32 %v514_v27, %v513_v0  ;;  %v491_v30 = vadd.f32 %v490_v54, %v489_v45 }
 0x367   :  { %v520_v6 = vsel %vm34_vm0, %v482_v25, 0.0 }
 0x368   :  { %v469_v22 = vpop.permute.xlu0 %468  ;;  %v521_v58 = vrot.slane %v520_v6, 4  ;;  %v516_v23 = vrot.slane %v515_v9, 2 }
 0x369   :  { %v483_v31 = vmul.f32 %v469_v22, %v1011_v13  ;;  %v500_v13 = vrot.slane %v499_v53, 4  ;;  %v498_v22 = vadd.f32 %v497_v47, %v496_v49 }
 0x36a   :  { %v522_v12 = vadd.f32 %v521_v58, %v520_v6  ;;  %v517_v21 = vadd.f32 %v516_v23, %v515_v9 }
 0x36b   :  { %v527_v7 = vsel %vm34_vm0, %v483_v31, 0.0  ;;  %v501_v34 = vadd.f32 %v500_v13, %v499_v53 }
 0x36c   :  { %v476_v59 = vpop.permute.xlu0 %475  ;;  %v528_v29 = vrot.slane %v527_v7, 4  ;;  %v523_v24 = vrot.slane %v522_v12, 2  ;;  %v518_v57 = vrot.slane %v517_v21, 1 }
 0x36d   :  { %v484_v51 = vmul.f32 %v476_v59, %v1013_v14  ;;  %v507_v14 = vrot.slane %v506_v1, 4  ;;  %v502_v39 = vrot.slane %v501_v34, 2 }
 0x36e   :  { %v529_v5 = vadd.f32 %v528_v29, %v527_v7  ;;  %v524_v50 = vadd.f32 %v523_v24, %v522_v12  ;;  %v519_v62 = vadd.f32 %v518_v57, %v517_v21 }
 0x36f   :  { %v534_v8 = vsel %vm34_vm0, %v484_v51, 0.0  ;;  %v508_v61 = vadd.f32 %v507_v14, %v506_v1  ;;  %v503_v41 = vadd.f32 %v502_v39, %v501_v34 }
 0x370   :  { %v535_v33 = vrot.slane %v534_v8, 4  ;;  %v530_v43 = vrot.slane %v529_v5, 2  ;;  %v525_v20 = vrot.slane %v524_v50, 1 }
 0x371   :  { %v509_v11 = vrot.slane %v508_v61, 2  ;;  %v504_v16 = vrot.slane %v503_v41, 1 }
 0x372   :  { %v536_v3 = vadd.f32 %v535_v33, %v534_v8  ;;  %v531_v52 = vadd.f32 %v530_v43, %v529_v5  ;;  %v526_v44 = vadd.f32 %v525_v20, %v524_v50 }
 0x373   :  { %v510_v46 = vadd.f32 %v509_v11, %v508_v61  ;;  %v505_v60 = vadd.f32 %v504_v16, %v503_v41 }
 0x374   :  { %v537_v48 = vrot.slane %v536_v3, 2  ;;  %v532_v37 = vrot.slane %v531_v52, 1 }
 0x375   :  { %v511_v19 = vrot.slane %v510_v46, 1 }
 0x376   :  { %v538_v56 = vadd.f32 %v537_v48, %v536_v3  ;;  %v533_v25 = vadd.f32 %v532_v37, %v531_v52 }
 0x377   :  { %v512_v26 = vadd.f32 %v511_v19, %v510_v46 }
 0x378   :  { %v539_v55 = vrot.slane %v538_v56, 1 }
 0x37a   :  { %v540_v31 = vadd.f32 %v539_v55, %v538_v56 }
 0x3de   :  { %v688_v59 = vpop.xlane.xlu1 %687 }
 0x3df   :  { %v705_v40 = vmul.f32 %v703_v18, %v688_v59 }
 0x3e1   :  { %v707_v51 = vrot.slane %v705_v40, 1  ;;  %v708_v32 = vrot.slane %v705_v40, 2  ;;  %v709_v53 = vrot.slane %v705_v40, 3  ;;  %v710_v2 = vrot.slane %v705_v40, 4 }
 0x3e2   :  { %v711_v1 = vrot.slane %v705_v40, 5  ;;  %v712_v28 = vrot.slane %v705_v40, 6  ;;  %v713_v0 = vrot.slane %v705_v40, 7  ;;  %v1261_v6 = vadd.f32 %v705_v40, %v491_v30 }
 0x3e3   :  { %v723_v7 = vadd.f32 %v707_v51, %v498_v22  ;;  %v724_v8 = vadd.f32 %v708_v32, %v505_v60  ;;  %v725_v42 = vadd.f32 %v709_v53, %v512_v26  ;;  %v1263_v13 = vadd.f32 %v710_v2, %v519_v62 }
 0x3e4   :  { %v1265_v10 = vadd.f32 %v711_v1, %v526_v44  ;;  %v1267_v14 = vadd.f32 %v712_v28, %v533_v25  ;;  %v1269_v27 = vadd.f32 %v713_v0, %v540_v31  ;;  %v730_v34 = vmul.f32 %v1261_v6, %v1261_v6 }
 0x3e5   :  { %v731_v58 = vmul.f32 %v723_v7, %v723_v7  ;;  %v732_v29 = vmul.f32 %v724_v8, %v724_v8  ;;  %v733_v33 = vmul.f32 %v725_v42, %v725_v42  ;;  %v734_v35 = vmul.f32 %v1263_v13, %v1263_v13 }
 0x3e6   :  { %v735_v38 = vmul.f32 %v1265_v10, %v1265_v10  ;;  %v736_v9 = vmul.f32 %v1267_v14, %v1267_v14  ;;  %v737_v12 = vmul.f32 %v1269_v27, %v1269_v27 }
 0x3e7   :  { %v746_v61 = vrot.slane %v731_v58, 7  ;;  %v748_v4 = vrot.slane %v732_v29, 6  ;;  %v750_v3 = vrot.slane %v733_v33, 5  ;;  %v752_v39 = vrot.slane %v734_v35, 4 }
 0x3e8   :  { %v754_v11 = vrot.slane %v735_v38, 3  ;;  %v756_v23 = vrot.slane %v736_v9, 2  ;;  %v758_v43 = vrot.slane %v737_v12, 1 }
 0x3e9   :  { %v747_v5 = vsel %vm182_vm1, %v746_v61, %v730_v34 }
 0x3ea   :  { %v749_v63 = vsel %vm184_vm2, %v748_v4, %v747_v5 }
 0x3eb   :  { %v751_v36 = vsel %vm186_vm3, %v750_v3, %v749_v63 }
 0x3ec   :  { %v753_v15 = vsel %vm188_vm4, %v752_v39, %v751_v36 }
 0x3ed   :  { %v755_v24 = vsel %vm190_vm5, %v754_v11, %v753_v15 }
 0x3ee   :  { %v757_v48 = vsel %vm192_vm6, %v756_v23, %v755_v24 }
 0x3ef   :  { %v759_v49 = vsel %vm194_vm7, %v758_v43, %v757_v48 }
 0x3f0   :  { %v761_v41 = vsel %vm34_vm0, %v759_v49, 0.0 }
 0x3f1   :  { %762 = vadd.xlane.f32.xlu0 %v761_v41 }
 0x47e   :  { %v763_v45 = vpop.xlane.xlu0 %762 }
 0x47f   :  { %890 = vrsqrt.f32 %v763_v45  ;;  %vm766_vm12 = vcmp.eq.f32.partialorder %v763_v45, inf  ;;  %v769_v21 = vand.u32 2147483648, %v763_v45  ;;  %vm768_vm13 = vcmp.eq.f32.partialorder %v763_v45, 0.0 }
 0x489   :  { %v891_v46 = vpop.eup %890 }
 0x48a   :  { %v765_v17 = vmul.f32 %v891_v46, %v763_v45 }
 0x48c   :  { %v767_v50 = vsel %vm766_vm12, %v763_v45, %v765_v17 }
 0x48d   :  { %v770_v52 = vsel %vm768_vm13, %v769_v21, %v767_v50 }
 0x48e   :  { %v771_v56 = vadd.f32 1e-08, %v770_v52 }
 0x490   :  { %v773_v47 = vrot.slane %v771_v56, 1  ;;  %v774_v16 = vrot.slane %v771_v56, 2  ;;  %v775_v54 = vrot.slane %v771_v56, 3  ;;  %v776_v19 = vrot.slane %v771_v56, 4 }
 0x491   :  { %892 = vrcp.f32 %v771_v56  ;;  %v777_v18 = vrot.slane %v771_v56, 5  ;;  %v778_v57 = vrot.slane %v771_v56, 6  ;;  %v779_v20 = vrot.slane %v771_v56, 7 }
 0x492   :  { %894 = vrcp.f32 %v773_v47 }
 0x493   :  { %896 = vrcp.f32 %v774_v16 }
 0x494   :  { %898 = vrcp.f32 %v775_v54 }
 0x495   :  { %900 = vrcp.f32 %v776_v19 }
 0x496   :  { %902 = vrcp.f32 %v777_v18 }
 0x497   :  { %904 = vrcp.f32 %v778_v57 }
 0x498   :  { %906 = vrcp.f32 %v779_v20 }
 0x49b   :  { %v893_v37 = vpop.eup %892 }
 0x49c   :  { %v895_v55 = vpop.eup %894  ;;  %v789_v40 = vmul.f32 %v893_v37, %v1261_v6 }
 0x49d   :  { %v897_v22 = vpop.eup %896  ;;  %v791_v59 = vmul.f32 %v895_v55, %v723_v7 }
 0x49e   :  { %v899_v60 = vpop.eup %898  ;;  %v793_v30 = vmul.f32 %v897_v22, %v724_v8 }
 0x49f   :  { %v901_v26 = vpop.eup %900  ;;  %v795_v62 = vmul.f32 %v899_v60, %v725_v42  ;;  %v812_v44 = vrot.slane %v791_v59, 7 }
 0x4a0   :  { %v903_v25 = vpop.eup %902  ;;  %v797_v31 = vmul.f32 %v901_v26, %v1263_v13  ;;  %v814_v51 = vrot.slane %v793_v30, 6 }
 0x4a1   :  { %v905_v32 = vpop.eup %904  ;;  %v799_v53 = vmul.f32 %v903_v25, %v1265_v10  ;;  %v813_v2 = vsel %vm182_vm1, %v812_v44, %v789_v40  ;;  %v816_v1 = vrot.slane %v795_v62, 5 }
 0x4a2   :  { %v907_v28 = vpop.eup %906  ;;  %v801_v0 = vmul.f32 %v905_v32, %v1267_v14  ;;  %v815_v7 = vsel %vm184_vm2, %v814_v51, %v813_v2  ;;  %v818_v8 = vrot.slane %v797_v31, 4 }
 0x4a3   :  { %v803_v6 = vmul.f32 %v907_v28, %v1269_v27  ;;  %v817_v42 = vsel %vm186_vm3, %v816_v1, %v815_v7  ;;  %v820_v58 = vrot.slane %v799_v53, 3 }
 0x4a4   :  { %v819_v13 = vsel %vm188_vm4, %v818_v8, %v817_v42  ;;  %v822_v29 = vrot.slane %v801_v0, 2 }
 0x4a5   :  { %v821_v33 = vsel %vm190_vm5, %v820_v58, %v819_v13  ;;  %v824_v10 = vrot.slane %v803_v6, 1 }
 0x4a6   :  { %v823_v35 = vsel %vm192_vm6, %v822_v29, %v821_v33 }
 0x4a7   :  { %v825_v34 = vsel %vm194_vm7, %v824_v10, %v823_v35 }
 0x4a8   :  { %827 = vst.msk [vmem:[#allocation5] sm:$0xff] %vm34_vm0, %v825_v34 }
 0x4a9   :  { %832 = vsyncadd [#allocation4], 96  ;;  %s961_s0 = smov [#allocation5]  }
 0x4aa   :  { %s833_s25 = sshll.u32 %s961_s0, 4  ;;  %s834_s25 = int_to_ptr.vmem [resolvable:$true] %s833_s25 }
 0x4ab   :  { %s930_s26 = scalar_lea.vmem %s834_s25, 32  ;;  %s934_s27 = scalar_lea.vmem %s834_s25, 128 }
 0x4ac   :  { %p931_p8 = scmp.ne.s32.totalorder %s834_s25, %s930_s26  ;;  %p935_p9 = scmp.lt.s32.totalorder %s834_s25, %s834_s25 }
 0x4ad   :  { %p936_p10 = scmp.lt.s32.totalorder %s934_s27, %s930_s26 }
 0x4af   :  { %p937_p11 = por %p936_p10, %p935_p9 }
 0x4b1   :  { %p938_p12 = pnand %p937_p11, %p931_p8 }
 0x4b3   :  { %941 = shalt.err (!%p938_p12)
}
 0x4b4   :  { %s942_s30 = scalar_lea.hbm %s1316_s2, 32 }
 0x4b5   :  { %p943_p13 = scmp.ne.s32.totalorder %s1316_s2, %s942_s30  ;;  %p946_p0 = scmp.lt.u32.totalorder %s942_s30, %s1316_s2 }
 0x4b7   :  { %p948_p1 = pnand %p946_p0, %p943_p13 }
 0x4b9   :  { %951 = shalt.err (!%p948_p1)
}
 0x4ba   :  { %s962_s7 = smov 32   ;;  %s963_s8 = smov 2  }
 0x4bb   :  { %839 = dma.vmem_to_hbm [thread:$0]  %s834_s25, 32, %s1316_s2, [#allocation4], %s962_s7, %s962_s7, %s963_s8  }
 0x4bc   :  { %954 = dma.done.wait [#allocation4], 128  }
 0x4bd   :  { %955 = vsyncadd [#allocation4], 4294967168 }
 0x4be   :  { %843 = vsyncpa [#allocation3], 1 }
 0x4bf   :  { %844 = vsyncpa [#allocation4], 1 }

</bundles_post_ra>
